<compile_context>
chip_gen: v7x
topology: tpu7x:2x2x1
jax: 0.10.0
libtpu: 0.0.40
codegen_flags: <defaults>
</compile_context>

<pallas_src>
import jax
import jax.numpy as jnp
from jax.experimental import pallas as pl
from jax.experimental.pallas import tpu as pltpu

LANES = 128


def _blend_kernel(w_ref, imgs_ref, out_ref):
    # w_ref:    SMEM (N,)  f32     pre-normalized blend weights (scalar prefetch)
    # imgs_ref: VMEM (N, rows, 128) lane-dense tile, one (rows,128) slab per image
    # out_ref:  VMEM (rows, 128)    blended output tile
    n = imgs_ref.shape[0]
    acc = imgs_ref[0].astype(jnp.float32) * w_ref[0]
    for i in range(1, n):
        acc = acc + imgs_ref[i].astype(jnp.float32) * w_ref[i]
    out_ref[...] = acc.astype(out_ref.dtype)


def blend(imgs, weights, *, target_block_bytes=8 << 20, min_kernel_bytes=1 << 20):
    """imgs: (N, C, H, W), weights: (N,) -> (1, C, H, W) weighted blend."""
    N, C, H, W = imgs.shape
    M = C * H * W
    itemsize = jnp.dtype(imgs.dtype).itemsize
    total_bytes = N * M * itemsize

    # Hoisted normalization: done once here instead of every grid step.
    w = (weights / jnp.sum(weights)).astype(jnp.float32)

    # Fallback: tiny inputs (launch overhead dominates) or ragged lane dim
    # (would need pad + post-kernel slice copy, pure overhead when mem-bound).
    if total_bytes < min_kernel_bytes or M % LANES != 0:
        out = (imgs.astype(jnp.float32) * w[:, None, None, None]).sum(
            axis=0, keepdims=True)
        return out.astype(imgs.dtype)

    R = M // LANES
    cube = imgs.reshape(N, R, LANES)

    # Dtype-aware sublane multiple: packed dtypes need deeper sublane tiles.
    sublane = {4: 8, 2: 16, 1: 32}.get(itemsize, 8)

    if R <= sublane:
        # Full-extent row block (block_shape equal to the array dim is legal
        # even when not sublane-aligned); grid degenerates to a single step.
        rows_blk = R
    else:
        # Rows per grid step from the block-byte budget...
        rows_blk = target_block_bytes // (N * LANES * itemsize)
        rows_blk = max(sublane, (rows_blk // sublane) * sublane)
        # ...capped so the grid has >= 2 steps (v7x megacore sharding)...
        half = ((pl.cdiv(R, 2) + sublane - 1) // sublane) * sublane
        rows_blk = min(rows_blk, half)
        # ...and never exceeding the array extent.
        rows_blk = min(rows_blk, (R // sublane) * sublane)

    grid = (pl.cdiv(R, rows_blk),)

    # Explicit scoped-VMEM budget: double-buffered input + output blocks plus
    # headroom for Mosaic internal scratch; capped for v7x's 64 MiB VMEM.
    blk_in = N * rows_blk * LANES * itemsize
    blk_out = rows_blk * LANES * itemsize
    vmem_limit = int(min(48 << 20, max(32 << 20, 2 * (blk_in + blk_out) + (8 << 20))))

    out_cube = pl.pallas_call(
        _blend_kernel,
        out_shape=jax.ShapeDtypeStruct((R, LANES), imgs.dtype),
        grid_spec=pltpu.PrefetchScalarGridSpec(
            num_scalar_prefetch=1,  # normalized weights -> SMEM
            grid=grid,
            in_specs=[
                pl.BlockSpec((N, rows_blk, LANES), lambda j, _w: (0, j, 0)),
            ],
            out_specs=pl.BlockSpec((rows_blk, LANES), lambda j, _w: (j, 0)),
        ),
        compiler_params=pltpu.CompilerParams(
            dimension_semantics=("parallel",),  # rows shard across v7x's 2 TCs
            vmem_limit_bytes=vmem_limit,
        ),
    )(w, cube)

    return out_cube.reshape(1, C, H, W)


def _reference(imgs, weights):
    w = weights / weights.sum()
    return (imgs * w[:, None, None, None]).sum(axis=0, keepdims=True)


if __name__ == "__main__":
    key = jax.random.PRNGKey(0)

    # Case 1: module-implied small shape (Blend(num_images=4), 4x16x16 images)
    # -> takes the fused-XLA short-circuit path.
    n1, C1, H1, W1 = 4, 4, 16, 16
    k1, k2 = jax.random.split(key)
    imgs_small = jax.random.normal(k1, (n1, C1, H1, W1), dtype=jnp.float32)
    weights_small = jnp.ones((n1,), dtype=jnp.float32) / n1
    out_small = jax.block_until_ready(blend(imgs_small, weights_small))
    ref_small = _reference(imgs_small, weights_small)
    assert out_small.shape == (1, C1, H1, W1)
    assert jnp.allclose(out_small, ref_small, atol=1e-5, rtol=1e-5)

    # Case 2: moderately larger shape that exercises the Pallas kernel path
    # (>= 1 MiB, lane-dense, grid of >= 2 steps for megacore sharding).
    n2, C2, H2, W2 = 4, 8, 128, 128
    imgs_big = jax.random.normal(k2, (n2, C2, H2, W2), dtype=jnp.float32)
    weights_big = jnp.arange(1.0, n2 + 1.0, dtype=jnp.float32)
    out_big = jax.block_until_ready(blend(imgs_big, weights_big))
    ref_big = _reference(imgs_big, weights_big)
    assert out_big.shape == (1, C2, H2, W2)
    assert jnp.allclose(out_big, ref_big, atol=1e-5, rtol=1e-5)

    print("KERNEL_OK")
</pallas_src>

<mosaic_0001>
module attributes {stable_mosaic.version = 11 : i64} {
  func.func @_blend_kernel(%arg0: i32, %arg1: memref<4xf32, #tpu.memory_space<smem>>, %arg2: memref<4x512x128xf32, #tpu.memory_space<vmem>>, %arg3: memref<512x128xf32, #tpu.memory_space<vmem>>) attributes {dimension_semantics = [#tpu.dimension_semantics<parallel>], iteration_bounds = array<i64: 2>, scalar_prefetch = 1 : i64, scratch_operands = 0 : i64, tpu.core_type = #tpu.core_type<tc>, window_params = [{transform_indices = @transform_0, window_bounds = array<i64: 4, 512, 128>}, {transform_indices = @transform_1, window_bounds = array<i64: 512, 128>}]} {
    %c0 = arith.constant 0 : index
    %c0_0 = arith.constant 0 : index
    %c0_1 = arith.constant 0 : index
    %0 = vector.load %arg2[%c0, %c0_0, %c0_1] : memref<4x512x128xf32, #tpu.memory_space<vmem>>, vector<1x512x128xf32>
    %1 = vector.shape_cast %0 : vector<1x512x128xf32> to vector<512x128xf32>
    %c0_2 = arith.constant 0 : index
    %2 = memref.load %arg1[%c0_2] : memref<4xf32, #tpu.memory_space<smem>>
    %3 = vector.broadcast %2 : f32 to vector<512x128xf32>
    %4 = arith.mulf %1, %3 : vector<512x128xf32>
    %c1 = arith.constant 1 : index
    %c0_3 = arith.constant 0 : index
    %c0_4 = arith.constant 0 : index
    %5 = vector.load %arg2[%c1, %c0_3, %c0_4] : memref<4x512x128xf32, #tpu.memory_space<vmem>>, vector<1x512x128xf32>
    %6 = vector.shape_cast %5 : vector<1x512x128xf32> to vector<512x128xf32>
    %c1_5 = arith.constant 1 : index
    %7 = memref.load %arg1[%c1_5] : memref<4xf32, #tpu.memory_space<smem>>
    %8 = vector.broadcast %7 : f32 to vector<512x128xf32>
    %9 = arith.mulf %6, %8 : vector<512x128xf32>
    %10 = arith.addf %4, %9 : vector<512x128xf32>
    %c2 = arith.constant 2 : index
    %c0_6 = arith.constant 0 : index
    %c0_7 = arith.constant 0 : index
    %11 = vector.load %arg2[%c2, %c0_6, %c0_7] : memref<4x512x128xf32, #tpu.memory_space<vmem>>, vector<1x512x128xf32>
    %12 = vector.shape_cast %11 : vector<1x512x128xf32> to vector<512x128xf32>
    %c2_8 = arith.constant 2 : index
    %13 = memref.load %arg1[%c2_8] : memref<4xf32, #tpu.memory_space<smem>>
    %14 = vector.broadcast %13 : f32 to vector<512x128xf32>
    %15 = arith.mulf %12, %14 : vector<512x128xf32>
    %16 = arith.addf %10, %15 : vector<512x128xf32>
    %c3 = arith.constant 3 : index
    %c0_9 = arith.constant 0 : index
    %c0_10 = arith.constant 0 : index
    %17 = vector.load %arg2[%c3, %c0_9, %c0_10] : memref<4x512x128xf32, #tpu.memory_space<vmem>>, vector<1x512x128xf32>
    %18 = vector.shape_cast %17 : vector<1x512x128xf32> to vector<512x128xf32>
    %c3_11 = arith.constant 3 : index
    %19 = memref.load %arg1[%c3_11] : memref<4xf32, #tpu.memory_space<smem>>
    %20 = vector.broadcast %19 : f32 to vector<512x128xf32>
    %21 = arith.mulf %18, %20 : vector<512x128xf32>
    %22 = arith.addf %16, %21 : vector<512x128xf32>
    %c0_12 = arith.constant 0 : index
    %c0_13 = arith.constant 0 : index
    %23 = vector.load %arg3[%c0_12, %c0_13] : memref<512x128xf32, #tpu.memory_space<vmem>>, vector<512x128xf32>
    tpu.vector_store %arg3[%c0_12, %c0_13], %22 {strides = array<i32>} : memref<512x128xf32, #tpu.memory_space<vmem>>, vector<512x128xf32>,
    return
  }
  func.func @transform_0(%arg0: i32, %arg1: memref<4xf32, #tpu.memory_space<smem>>) -> (i32, i32, i32) {
    %c0_i32 = arith.constant 0 : i32
    %c0_i32_0 = arith.constant 0 : i32
    %c0_i32_1 = arith.constant 0 : i32
    return %c0_i32, %arg0, %c0_i32_0 : i32, i32, i32
  }
  func.func @transform_1(%arg0: i32, %arg1: memref<4xf32, #tpu.memory_space<smem>>) -> (i32, i32) {
    %c0_i32 = arith.constant 0 : i32
    %c0_i32_0 = arith.constant 0 : i32
    return %arg0, %c0_i32 : i32, i32
  }
}

</mosaic_0001>

<bundles_post_ra>
// kernel: tpu_custom_call.1
= control target key start
LH: loop header
LB: loop body
LE: loop exit
PB: predicated region body
PF: predicated region fallthrough
CT: control target
= control target key end

     0   :  { %s2153_s0 = inlined_call_operand.hbm [shape: f32[4], index: 0, kind: input, shape index: {}]   ;;  %s2154_s1 = inlined_call_operand.hbm [shape: f32[4,1024,128], index: 1, kind: input, shape index: {}]   ;;  %s2155_s2 = inlined_call_operand.hbm [shape: f32[1024,128], index: 2, kind: output, shape index: {}]  }
   0x1   :  { %s1303_s11 = scalar_lea.hbm %s2153_s0, 16 }
   0x2   :  { %p1304_p0 = scmp.ne.s32.totalorder %s2153_s0, %s1303_s11  ;;  %p1307_p1 = scmp.lt.u32.totalorder %s1303_s11, %s2153_s0 }
   0x4   :  { %p1309_p2 = pnand %p1307_p1, %p1304_p0 }
   0x6   :  { %1312 = shalt.err (!%p1309_p2)  }
   0x7   :  { %s1383_s16 = smov [#allocation3]  }
   0x8   :  { %8 = dma.hbm_to_smem %s2153_s0, 16, %s1383_s16, [#allocation2] }
   0x9   :  { %1357 = dma.done.wait [#allocation2], 16 }
   0xa   :  { %1358 = vsyncadd [#allocation2], 4294967280 }
   0xb   :  { %10 = sfence }
   0xc   :  { %11 = vsyncpa [#allocation5], 0 }
   0xd   :  { %13 = vsyncpa [#allocation5 + $0x1], 0 }
   0xe   :  { %14 = vsyncpa [#allocation6], 0 }
   0xf   :  { %16 = vsyncpa [#allocation6 + $0x1], 0  ;;  %s1420_s19 = smov 0   ;;  %s1422_s20 = smov 0  }
  0x10   :  { %s1424_s21 = smov 0   ;;  %s1426_s22 = smov 0  }
  0x11 LB: > { %s1441_s0 = sadd.s32 4294967295, %s1381_s22   ;;  %s1033_s23 = sadd.s32 4294967294, %s1381_s22   ;;  %s1381_s22 = sphi %s1426_s22, %s2163_s22   ;;  %s1377_s21 = sphi %s1424_s21, %s2162_s21   ;;  %s1373_s20 = sphi %s1422_s20, %s2161_s20   ;;  %s1369_s19 = sphi %s1420_s19, %s2160_s19  }
  0x12   : > { %s1445_s24 = sadd.s32 1, %s1381_s22   ;;  %s29_s25 = sadd.s32 1, %s1377_s21 }
  0x13   : > { %s26_s26 = ssub.s32 %s1381_s22, %s1445_s24  ;;  %p36_p3 = scmp.ne.s32.totalorder %s1377_s21, %s1373_s20 }
  0x14   : > { %p27_p4 = scmp.eq.s32.totalorder %s26_s26, 0  ;;  %p37_p5 = scmp.eq.s32.totalorder %s1381_s22, 0 }
  0x15   : > { %p42_p6 = scmp.ne.s32.totalorder %s1373_s20, %s1369_s19  ;;  %p43_p7 = scmp.eq.s32.totalorder %s1441_s0, 0 }
  0x16   : > { %s1457_s27 = scalar_select %p27_p4, %s1377_s21, %s29_s25  }
  0x17   : > { %p1459_p8 = por %p37_p5, %p36_p3  ;;  %p1463_p9 = por %p43_p7, %p42_p6 }
  0x18   : > { %p66_p10 = scmp.eq.s32.totalorder %s1441_s0, 1  ;;  %p72_p11 = scmp.eq.s32.totalorder %s1033_s23, 1 }
  0x19   : > { %p1035_p0 = scmp.ge.s32.totalorder %s1381_s22, 2 }
  0x1a   : > { %p1468_p12 = por %p66_p10, %p36_p3  ;;  %p1472_p13 = por %p72_p11, %p42_p6 }
  0x1b   : > { %88 = sbr.rel (%p1035_p0) target bundleno = 47 (0x2f), region = 16 }
  0x22   : > { %s92_s4 = sand.u32 1, %s1377_s21   ;;  %s1244_s5 = sshll.u32 %s1381_s22, 13 }
  0x23   : > { %s1036_s6 = sshll.u32 %s92_s4, 11  ;;  %s102_s9 = scalar_lea.hbm %s2154_s1, %s1244_s5 }
  0x24   : > { %s1246_s10 = scalar_select %p1459_p8, [#allocation0], [#allocation10] }
  0x25   : > { %s96_s11 = scalar_lea.vmem [#allocation4], %s1036_s6  ;;  %s1384_s14 = smov 16384  }
  0x26   : > { %s115_s12 = sshll.u32 %s96_s11, 4  ;;  %s107_s13 = sld [smem:[%s1246_s10]]   ;;  %s116_s12 = int_to_ptr.vmem [resolvable:$true] %s115_s12 }
  0x27   : > { %1247 = sst [smem:[#allocation9]] (%p1459_p8), %s1384_s14  ;;  %s1385_s15 = smov 8192  }
  0x28   : > { %1248 = sst [smem:[#allocation9 + $0x1]] (%p1459_p8), %s1385_s15  ;;  %s1386_s16 = smov 64  }
  0x29   : > { %1249 = sst [smem:[#allocation9 + $0x2]] (%p1459_p8), %s1386_s16  ;;  %s1387_s17 = smov 128  }
  0x2a   : > { %1250 = sst [smem:[#allocation9 + $0x3]] (%p1459_p8), %s1387_s17  ;;  %s1388_s23 = smov 8  }
  0x2b   : > { %1251 = sst [smem:[#allocation9 + $0x4]] (%p1459_p8), %s1387_s17  ;;  %s93_s26 = scalar_lea.sflag [#allocation5], %s92_s4 }
  0x2c   : > { %s1039_s18 = sshll.u32 %s107_s13, 26  ;;  %1252 = sst [smem:[#allocation9 + $0x5]] (%p1459_p8), %s1388_s23 }
  0x2d   : > { %s1040_s25 = sadd.s32 134217728, %s1039_s18  ;;  %s1389_s5 = smov [#allocation8]  }
  0x2e   : > { %1253 = dma.general (%p1459_p8), %s102_s9, 32768, %s116_s12, %s93_s26, %s1389_s5, [#allocation9], %s1040_s25, 0  }
  0x2f PF: > { %p1041_p1 = scmp.ge.s32.totalorder %s1381_s22, 1  ;;  %p136_p2 = scmp.lt.s32.totalorder %s1381_s22, 3 }
  0x31   : > { %p137_p3 = pnand %p1041_p1, %p136_p2 }
  0x32   : > { %s1503_s6 = sand.u32 (!%p137_p3), 1, %s1373_s20  }
  0x33   : > { %140 = sbr.rel (%p137_p3) target bundleno = 198 (0xc6), region = 24  ;;  %s1042_s7 = sshll.u32 (!%p137_p3), %s1503_s6, 11 }
  0x34   : > { %s143_s8 = scalar_lea.sflag (!%p137_p3), [#allocation5], %s1503_s6  ;;  %s1507_s10 = scalar_lea.vmem (!%p137_p3), [#allocation4], %s1042_s7 }
  0x3a   : > { %1360 = dma.done.wait (%p1463_p9), %s143_s8, 32768  }
  0x3b   : > { %1362 = vsyncadd (%p1463_p9), %s143_s8, 4294934528  ;;  %s231_s28 = sld [smem:[#allocation3]]  ;;  %s1108_s4 = sld [smem:[#allocation3 + $0x1]]  ;;  %v167_v0 = vld [vmem:[%s1507_s10] sm:$0xff]  ;;  %v168_v8 = vld [vmem:[%s1507_s10 + $0x8] sm:$0xff] }
  0x3c   : > { %s1173_s9 = sld [smem:[#allocation3 + $0x2]]  ;;  %s1238_s11 = sld [smem:[#allocation3 + $0x3]]  ;;  %v1044_v2 = vld [vmem:[%s1507_s10 + $0x200] sm:$0xff]  ;;  %v1045_v13 = vld [vmem:[%s1507_s10 + $0x208] sm:$0xff]  ;;  %v169_v20 = vld [vmem:[%s1507_s10 + $0x10] sm:$0xff] }
  0x3d   : > { %v1109_v3 = vld [vmem:[%s1507_s10 + $0x400] sm:$0xff]  ;;  %v1110_v14 = vld [vmem:[%s1507_s10 + $0x408] sm:$0xff]  ;;  %v1046_v21 = vld [vmem:[%s1507_s10 + $0x210] sm:$0xff]  ;;  %s1043_s29 = sshll.u32 %s1503_s6, 9  ;;  %s1245_s13 = sshll.u32 %s1441_s0, 13 }
  0x3e   : > { %v1174_v7 = vld [vmem:[%s1507_s10 + $0x600] sm:$0xff]  ;;  %v1175_v15 = vld [vmem:[%s1507_s10 + $0x608] sm:$0xff]  ;;  %v1111_v22 = vld [vmem:[%s1507_s10 + $0x410] sm:$0xff]  ;;  %s1574_s12 = scalar_lea.vmem [#allocation7], %s1043_s29  ;;  %s2105_s17 = scalar_lea.hbm %s2155_s2, %s1245_s13 }
  0x3f   : > { %v1176_v27 = vld [vmem:[%s1507_s10 + $0x610] sm:$0xff]  ;;  %v170_v28 = vld [vmem:[%s1507_s10 + $0x18] sm:$0xff]  ;;  %v171_v36 = vld [vmem:[%s1507_s10 + $0x20] sm:$0xff]  ;;  %s960_s14 = sshll.u32 %s1574_s12, 4  ;;  %s947_s18 = scalar_lea.sflag [#allocation6], %s1503_s6  ;;  %s2107_s14 = int_to_ptr.vmem [resolvable:$true] %s960_s14 }
  0x40   : > { %v1047_v29 = vld [vmem:[%s1507_s10 + $0x218] sm:$0xff]  ;;  %v1048_v41 = vld [vmem:[%s1507_s10 + $0x220] sm:$0xff]  ;;  %v172_v48 = vld [vmem:[%s1507_s10 + $0x28] sm:$0xff]  ;;  %s1313_s23 = scalar_lea.vmem %s2107_s14, 8192  ;;  %s1390_s0 = smov [#allocation7]  }
  0x41   : > { %v1514_v1 = vstv %s231_s28  ;;  %v1519_v5 = vstv %s1108_s4  ;;  %v1112_v34 = vld [vmem:[%s1507_s10 + $0x418] sm:$0xff]  ;;  %v1113_v42 = vld [vmem:[%s1507_s10 + $0x420] sm:$0xff]  ;;  %p1314_p4 = scmp.ne.s32.totalorder %s2107_s14, %s1313_s23  ;;  %s1317_s25 = sshll.u32 %s1390_s0, 4  ;;  %s1318_s25 = int_to_ptr.vmem [resolvable:$false] %s1317_s25 }
  0x42   : > { %v233_v4 = vmul.f32 %v1514_v1, %v167_v0  ;;  %v1521_v6 = vstv %s1173_s9  ;;  %v364_v9 = vmul.f32 %v1044_v2, %v1519_v5  ;;  %v1527_v11 = vstv %s1238_s11  ;;  %v1177_v35 = vld [vmem:[%s1507_s10 + $0x618] sm:$0xff]  ;;  %v1178_v43 = vld [vmem:[%s1507_s10 + $0x620] sm:$0xff]  ;;  %s1319_s26 = scalar_lea.vmem %s1318_s25, 16384  ;;  %p1320_p7 = scmp.lt.s32.totalorder %s2107_s14, %s1318_s25 }
  0x43   : > { %v559_v10 = vmul.f32 %v1109_v3, %v1521_v6  ;;  %v234_v12 = vmul.f32 %v1514_v1, %v168_v8  ;;  %v754_v16 = vmul.f32 %v1174_v7, %v1527_v11  ;;  %v365_v17 = vmul.f32 %v1045_v13, %v1519_v5  ;;  %v1049_v49 = vld [vmem:[%s1507_s10 + $0x228] sm:$0xff]  ;;  %v173_v56 = vld [vmem:[%s1507_s10 + $0x30] sm:$0xff]  ;;  %v174_v0 = vld [vmem:[%s1507_s10 + $0x38] sm:$0xff]  ;;  %p1315_p5 = pnand %p1314_p4, %p1468_p12  ;;  %p1321_p8 = scmp.lt.s32.totalorder %s1319_s26, %s1313_s23 }
  0x44   : > { %v560_v18 = vmul.f32 %v1110_v14, %v1521_v6  ;;  %v755_v19 = vmul.f32 %v1175_v15, %v1527_v11  ;;  %v428_v23 = vadd.f32 %v364_v9, %v233_v4  ;;  %v235_v24 = vmul.f32 %v1514_v1, %v169_v20  ;;  %v1114_v50 = vld [vmem:[%s1507_s10 + $0x428] sm:$0xff]  ;;  %v1050_v57 = vld [vmem:[%s1507_s10 + $0x230] sm:$0xff]  ;;  %v1051_v8 = vld [vmem:[%s1507_s10 + $0x238] sm:$0xff] }
  0x45   : > { %v366_v25 = vmul.f32 %v1046_v21, %v1519_v5  ;;  %v561_v26 = vmul.f32 %v1111_v22, %v1521_v6  ;;  %v429_v30 = vadd.f32 %v365_v17, %v234_v12  ;;  %v756_v31 = vmul.f32 %v1176_v27, %v1527_v11  ;;  %v1179_v55 = vld [vmem:[%s1507_s10 + $0x628] sm:$0xff]  ;;  %v1115_v62 = vld [vmem:[%s1507_s10 + $0x430] sm:$0xff]  ;;  %v1116_v9 = vld [vmem:[%s1507_s10 + $0x438] sm:$0xff]  ;;  %p1316_p6 = pneg %p1315_p5  ;;  %p1322_p9 = por %p1321_p8, %p1320_p7 }
  0x46   : > { %v236_v32 = vmul.f32 %v1514_v1, %v170_v28  ;;  %v367_v33 = vmul.f32 %v1047_v29, %v1519_v5  ;;  %v623_v37 = vadd.f32 %v559_v10, %v428_v23  ;;  %v562_v39 = vmul.f32 %v1112_v34, %v1521_v6  ;;  %v1180_v63 = vld [vmem:[%s1507_s10 + $0x630] sm:$0xff]  ;;  %v1181_v15 = vld [vmem:[%s1507_s10 + $0x638] sm:$0xff]  ;;  %v1052_v17 = vld [vmem:[%s1507_s10 + $0x240] sm:$0xff] }
  0x47   : > { %v430_v38 = vadd.f32 %v366_v25, %v235_v24  ;;  %v757_v40 = vmul.f32 %v1177_v35, %v1527_v11  ;;  %v624_v44 = vadd.f32 %v560_v18, %v429_v30  ;;  %v237_v46 = vmul.f32 %v1514_v1, %v171_v36  ;;  %v1117_v22 = vld [vmem:[%s1507_s10 + $0x440] sm:$0xff]  ;;  %v176_v28 = vld [vmem:[%s1507_s10 + $0x48] sm:$0xff]  ;;  %p1323_p10 = pnand %p1322_p9, %p1316_p6 }
  0x48   : > { %v431_v45 = vadd.f32 %v367_v33, %v236_v32  ;;  %v368_v47 = vmul.f32 %v1048_v41, %v1519_v5  ;;  %v818_v51 = vadd.f32 %v754_v16, %v623_v37  ;;  %v563_v53 = vmul.f32 %v1113_v42, %v1521_v6  ;;  %v175_v16 = vld [vmem:[%s1507_s10 + $0x40] sm:$0xff]  ;;  %v1053_v29 = vld [vmem:[%s1507_s10 + $0x248] sm:$0xff]  ;;  %v1054_v41 = vld [vmem:[%s1507_s10 + $0x250] sm:$0xff] }
  0x49   : > { %v625_v52 = vadd.f32 %v561_v26, %v430_v38  ;;  %v758_v54 = vmul.f32 %v1178_v43, %v1527_v11  ;;  %v819_v58 = vadd.f32 %v755_v19, %v624_v44  ;;  %v238_v61 = vmul.f32 %v1514_v1, %v172_v48  ;;  %v1182_v23 = vld [vmem:[%s1507_s10 + $0x640] sm:$0xff]  ;;  %v1118_v34 = vld [vmem:[%s1507_s10 + $0x448] sm:$0xff]  ;;  %v178_v48 = vld [vmem:[%s1507_s10 + $0x58] sm:$0xff] }
  0x4a   : > { %v626_v59 = vadd.f32 %v562_v39, %v431_v45  ;;  %v432_v60 = vadd.f32 %v368_v47, %v237_v46  ;;  %882 = vst [vmem:[%s1574_s12] sm:$0xff] %v818_v51  ;;  %v369_v3 = vmul.f32 %v1049_v49, %v1519_v5  ;;  %v564_v4 = vmul.f32 %v1114_v50, %v1521_v6  ;;  %v1183_v35 = vld [vmem:[%s1507_s10 + $0x648] sm:$0xff]  ;;  %v1119_v46 = vld [vmem:[%s1507_s10 + $0x450] sm:$0xff] }
  0x4b   : > { %v820_v2 = vadd.f32 %v756_v31, %v625_v52  ;;  %v759_v7 = vmul.f32 %v1179_v55, %v1527_v11  ;;  %883 = vst [vmem:[%s1574_s12 + $0x8] sm:$0xff] %v819_v58  ;;  %v239_v13 = vmul.f32 %v1514_v1, %v173_v56  ;;  %v370_v14 = vmul.f32 %v1050_v57, %v1519_v5  ;;  %v1184_v47 = vld [vmem:[%s1507_s10 + $0x650] sm:$0xff] }
  0x4c   : > { %v821_v10 = vadd.f32 %v757_v40, %v626_v59  ;;  %v627_v12 = vadd.f32 %v563_v53, %v432_v60  ;;  %v433_v18 = vadd.f32 %v369_v3, %v238_v61  ;;  %v565_v19 = vmul.f32 %v1115_v62, %v1521_v6  ;;  %v177_v40 = vld [vmem:[%s1507_s10 + $0x50] sm:$0xff]  ;;  %v1055_v53 = vld [vmem:[%s1507_s10 + $0x258] sm:$0xff]  ;;  %v179_v60 = vld [vmem:[%s1507_s10 + $0x60] sm:$0xff] }
  0x4d   : > { %884 = vst [vmem:[%s1574_s12 + $0x10] sm:$0xff] %v820_v2  ;;  %v760_v20 = vmul.f32 %v1180_v63, %v1527_v11  ;;  %v240_v21 = vmul.f32 %v1514_v1, %v174_v0  ;;  %v434_v25 = vadd.f32 %v370_v14, %v239_v13  ;;  %v371_v26 = vmul.f32 %v1051_v8, %v1519_v5  ;;  %v1185_v59 = vld [vmem:[%s1507_s10 + $0x658] sm:$0xff]  ;;  %v1056_v61 = vld [vmem:[%s1507_s10 + $0x260] sm:$0xff]  ;;  %v1057_v13 = vld [vmem:[%s1507_s10 + $0x268] sm:$0xff] }
  0x4e   : > { %885 = vst [vmem:[%s1574_s12 + $0x18] sm:$0xff] %v821_v10  ;;  %v822_v24 = vadd.f32 %v758_v54, %v627_v12  ;;  %v566_v27 = vmul.f32 %v1116_v9, %v1521_v6  ;;  %v628_v30 = vadd.f32 %v564_v4, %v433_v18  ;;  %v761_v31 = vmul.f32 %v1181_v15, %v1527_v11  ;;  %v1120_v54 = vld [vmem:[%s1507_s10 + $0x458] sm:$0xff]  ;;  %v1121_v3 = vld [vmem:[%s1507_s10 + $0x460] sm:$0xff]  ;;  %v180_v12 = vld [vmem:[%s1507_s10 + $0x68] sm:$0xff] }
  0x4f   : > { %v241_v32 = vmul.f32 %v1514_v1, %v175_v16  ;;  %v372_v33 = vmul.f32 %v1052_v17, %v1519_v5  ;;  %v629_v36 = vadd.f32 %v565_v19, %v434_v25  ;;  %v435_v37 = vadd.f32 %v371_v26, %v240_v21  ;;  %v1186_v10 = vld [vmem:[%s1507_s10 + $0x660] sm:$0xff]  ;;  %v1122_v18 = vld [vmem:[%s1507_s10 + $0x468] sm:$0xff]  ;;  %v1058_v25 = vld [vmem:[%s1507_s10 + $0x270] sm:$0xff] }
  0x50   : > { %886 = vst [vmem:[%s1574_s12 + $0x20] sm:$0xff] %v822_v24  ;;  %v567_v38 = vmul.f32 %v1117_v22, %v1521_v6  ;;  %v762_v39 = vmul.f32 %v1182_v23, %v1527_v11  ;;  %v823_v42 = vadd.f32 %v759_v7, %v628_v30  ;;  %v242_v44 = vmul.f32 %v1514_v1, %v176_v28  ;;  %v1187_v19 = vld [vmem:[%s1507_s10 + $0x668] sm:$0xff]  ;;  %v181_v24 = vld [vmem:[%s1507_s10 + $0x70] sm:$0xff] }
  0x51   : > { %v436_v43 = vadd.f32 %v372_v33, %v241_v32  ;;  %v373_v45 = vmul.f32 %v1053_v29, %v1519_v5  ;;  %v824_v49 = vadd.f32 %v760_v20, %v629_v36  ;;  %v630_v50 = vadd.f32 %v566_v27, %v435_v37  ;;  %v1123_v30 = vld [vmem:[%s1507_s10 + $0x470] sm:$0xff]  ;;  %v182_v32 = vld [vmem:[%s1507_s10 + $0x78] sm:$0xff] }
  0x52   : > { %v568_v51 = vmul.f32 %v1118_v34, %v1521_v6  ;;  %v763_v52 = vmul.f32 %v1183_v35, %v1527_v11  ;;  %887 = vst [vmem:[%s1574_s12 + $0x28] sm:$0xff] %v823_v42  ;;  %v243_v57 = vmul.f32 %v1514_v1, %v177_v40  ;;  %v374_v58 = vmul.f32 %v1054_v41, %v1519_v5  ;;  %v1059_v37 = vld [vmem:[%s1507_s10 + $0x278] sm:$0xff] }
  0x53   : > { %v631_v55 = vadd.f32 %v567_v38, %v436_v43  ;;  %v437_v56 = vadd.f32 %v373_v45, %v242_v44  ;;  %888 = vst [vmem:[%s1574_s12 + $0x30] sm:$0xff] %v824_v49  ;;  %v825_v62 = vadd.f32 %v761_v31, %v630_v50  ;;  %v569_v63 = vmul.f32 %v1119_v46, %v1521_v6  ;;  %v1188_v31 = vld [vmem:[%s1507_s10 + $0x670] sm:$0xff]  ;;  %v1124_v38 = vld [vmem:[%s1507_s10 + $0x478] sm:$0xff]  ;;  %v183_v44 = vld [vmem:[%s1507_s10 + $0x80] sm:$0xff] }
  0x54   : > { %v764_v0 = vmul.f32 %v1184_v47, %v1527_v11  ;;  %v244_v2 = vmul.f32 %v1514_v1, %v178_v48  ;;  %v438_v8 = vadd.f32 %v374_v58, %v243_v57  ;;  %v375_v9 = vmul.f32 %v1055_v53, %v1519_v5  ;;  %v1189_v43 = vld [vmem:[%s1507_s10 + $0x678] sm:$0xff]  ;;  %v1060_v45 = vld [vmem:[%s1507_s10 + $0x280] sm:$0xff]  ;;  %v1061_v57 = vld [vmem:[%s1507_s10 + $0x288] sm:$0xff] }
  0x55   : > { %v826_v4 = vadd.f32 %v762_v39, %v631_v55  ;;  %v632_v7 = vadd.f32 %v568_v51, %v437_v56  ;;  %889 = vst [vmem:[%s1574_s12 + $0x38] sm:$0xff] %v825_v62  ;;  %v570_v14 = vmul.f32 %v1120_v54, %v1521_v6  ;;  %v765_v15 = vmul.f32 %v1185_v59, %v1527_v11  ;;  %v1125_v50 = vld [vmem:[%s1507_s10 + $0x480] sm:$0xff]  ;;  %v184_v56 = vld [vmem:[%s1507_s10 + $0x88] sm:$0xff] }
  0x56   : > { %v245_v16 = vmul.f32 %v1514_v1, %v179_v60  ;;  %v376_v17 = vmul.f32 %v1056_v61, %v1519_v5  ;;  %v633_v21 = vadd.f32 %v569_v63, %v438_v8  ;;  %v439_v22 = vadd.f32 %v375_v9, %v244_v2  ;;  %v1190_v55 = vld [vmem:[%s1507_s10 + $0x680] sm:$0xff]  ;;  %v1126_v62 = vld [vmem:[%s1507_s10 + $0x488] sm:$0xff]  ;;  %v1062_v8 = vld [vmem:[%s1507_s10 + $0x290] sm:$0xff] }
  0x57   : > { %890 = vst [vmem:[%s1574_s12 + $0x40] sm:$0xff] %v826_v4  ;;  %v827_v20 = vadd.f32 %v763_v52, %v632_v7  ;;  %v571_v23 = vmul.f32 %v1121_v3, %v1521_v6  ;;  %v766_v27 = vmul.f32 %v1186_v10, %v1527_v11  ;;  %v246_v28 = vmul.f32 %v1514_v1, %v180_v12  ;;  %v1191_v63 = vld [vmem:[%s1507_s10 + $0x688] sm:$0xff]  ;;  %v185_v7 = vld [vmem:[%s1507_s10 + $0x90] sm:$0xff] }
  0x58   : > { %v440_v26 = vadd.f32 %v376_v17, %v245_v16  ;;  %v377_v29 = vmul.f32 %v1057_v13, %v1519_v5  ;;  %v828_v33 = vadd.f32 %v764_v0, %v633_v21  ;;  %v634_v34 = vadd.f32 %v570_v14, %v439_v22  ;;  %v1127_v14 = vld [vmem:[%s1507_s10 + $0x490] sm:$0xff]  ;;  %v186_v16 = vld [vmem:[%s1507_s10 + $0x98] sm:$0xff] }
  0x59   : > { %891 = vst [vmem:[%s1574_s12 + $0x48] sm:$0xff] %v827_v20  ;;  %v572_v35 = vmul.f32 %v1122_v18, %v1521_v6  ;;  %v767_v36 = vmul.f32 %v1187_v19, %v1527_v11  ;;  %v247_v41 = vmul.f32 %v1514_v1, %v181_v24  ;;  %v378_v42 = vmul.f32 %v1058_v25, %v1519_v5  ;;  %v1063_v21 = vld [vmem:[%s1507_s10 + $0x298] sm:$0xff] }
  0x5a   : > { %v635_v39 = vadd.f32 %v571_v23, %v440_v26  ;;  %v441_v40 = vadd.f32 %v377_v29, %v246_v28  ;;  %892 = vst [vmem:[%s1574_s12 + $0x50] sm:$0xff] %v828_v33  ;;  %v829_v46 = vadd.f32 %v765_v15, %v634_v34  ;;  %v573_v47 = vmul.f32 %v1123_v30, %v1521_v6  ;;  %v1192_v15 = vld [vmem:[%s1507_s10 + $0x690] sm:$0xff]  ;;  %v1128_v22 = vld [vmem:[%s1507_s10 + $0x498] sm:$0xff]  ;;  %v187_v28 = vld [vmem:[%s1507_s10 + $0xa0] sm:$0xff] }
  0x5b   : > { %v768_v48 = vmul.f32 %v1188_v31, %v1527_v11  ;;  %v248_v49 = vmul.f32 %v1514_v1, %v182_v32  ;;  %v442_v53 = vadd.f32 %v378_v42, %v247_v41  ;;  %v379_v54 = vmul.f32 %v1059_v37, %v1519_v5  ;;  %v1064_v29 = vld [vmem:[%s1507_s10 + $0x2a0] sm:$0xff]  ;;  %v1065_v41 = vld [vmem:[%s1507_s10 + $0x2a8] sm:$0xff] }
  0x5c   : > { %v830_v51 = vadd.f32 %v766_v27, %v635_v39  ;;  %v636_v52 = vadd.f32 %v572_v35, %v441_v40  ;;  %893 = vst [vmem:[%s1574_s12 + $0x58] sm:$0xff] %v829_v46  ;;  %v574_v58 = vmul.f32 %v1124_v38, %v1521_v6  ;;  %v769_v59 = vmul.f32 %v1189_v43, %v1527_v11  ;;  %v1193_v27 = vld [vmem:[%s1507_s10 + $0x698] sm:$0xff]  ;;  %v1129_v34 = vld [vmem:[%s1507_s10 + $0x4a0] sm:$0xff]  ;;  %v188_v40 = vld [vmem:[%s1507_s10 + $0xa8] sm:$0xff] }
  0x5d   : > { %v249_v60 = vmul.f32 %v1514_v1, %v183_v44  ;;  %v380_v61 = vmul.f32 %v1060_v45, %v1519_v5  ;;  %v637_v2 = vadd.f32 %v573_v47, %v442_v53  ;;  %v443_v3 = vadd.f32 %v379_v54, %v248_v49  ;;  %v1194_v39 = vld [vmem:[%s1507_s10 + $0x6a0] sm:$0xff]  ;;  %v1130_v46 = vld [vmem:[%s1507_s10 + $0x4a8] sm:$0xff]  ;;  %v1066_v53 = vld [vmem:[%s1507_s10 + $0x2b0] sm:$0xff] }
  0x5e   : > { %894 = vst [vmem:[%s1574_s12 + $0x60] sm:$0xff] %v830_v51  ;;  %v831_v0 = vadd.f32 %v767_v36, %v636_v52  ;;  %v575_v4 = vmul.f32 %v1125_v50, %v1521_v6  ;;  %v770_v10 = vmul.f32 %v1190_v55, %v1527_v11  ;;  %v250_v12 = vmul.f32 %v1514_v1, %v184_v56  ;;  %v1195_v47 = vld [vmem:[%s1507_s10 + $0x6a8] sm:$0xff]  ;;  %v189_v52 = vld [vmem:[%s1507_s10 + $0xb0] sm:$0xff] }
  0x5f   : > { %v444_v9 = vadd.f32 %v380_v61, %v249_v60  ;;  %v381_v13 = vmul.f32 %v1061_v57, %v1519_v5  ;;  %v832_v17 = vadd.f32 %v768_v48, %v637_v2  ;;  %v638_v18 = vadd.f32 %v574_v58, %v443_v3  ;;  %v1131_v58 = vld [vmem:[%s1507_s10 + $0x4b0] sm:$0xff]  ;;  %v190_v60 = vld [vmem:[%s1507_s10 + $0xb8] sm:$0xff] }
  0x60   : > { %895 = vst [vmem:[%s1574_s12 + $0x68] sm:$0xff] %v831_v0  ;;  %v576_v19 = vmul.f32 %v1126_v62, %v1521_v6  ;;  %v771_v20 = vmul.f32 %v1191_v63, %v1527_v11  ;;  %v251_v25 = vmul.f32 %v1514_v1, %v185_v7  ;;  %v382_v26 = vmul.f32 %v1062_v8, %v1519_v5  ;;  %v1067_v2 = vld [vmem:[%s1507_s10 + $0x2b8] sm:$0xff] }
  0x61   : > { %v639_v23 = vadd.f32 %v575_v4, %v444_v9  ;;  %v445_v24 = vadd.f32 %v381_v13, %v250_v12  ;;  %896 = vst [vmem:[%s1574_s12 + $0x70] sm:$0xff] %v832_v17  ;;  %v833_v30 = vadd.f32 %v769_v59, %v638_v18  ;;  %v577_v31 = vmul.f32 %v1127_v14, %v1521_v6  ;;  %v1196_v59 = vld [vmem:[%s1507_s10 + $0x6b0] sm:$0xff]  ;;  %v1132_v3 = vld [vmem:[%s1507_s10 + $0x4b8] sm:$0xff]  ;;  %v191_v12 = vld [vmem:[%s1507_s10 + $0xc0] sm:$0xff] }
  0x62   : > { %v772_v32 = vmul.f32 %v1192_v15, %v1527_v11  ;;  %v252_v33 = vmul.f32 %v1514_v1, %v186_v16  ;;  %v446_v37 = vadd.f32 %v382_v26, %v251_v25  ;;  %v383_v38 = vmul.f32 %v1063_v21, %v1519_v5  ;;  %v1068_v13 = vld [vmem:[%s1507_s10 + $0x2c0] sm:$0xff]  ;;  %v1069_v25 = vld [vmem:[%s1507_s10 + $0x2c8] sm:$0xff] }
  0x63   : > { %v834_v35 = vadd.f32 %v770_v10, %v639_v23  ;;  %v640_v36 = vadd.f32 %v576_v19, %v445_v24  ;;  %897 = vst [vmem:[%s1574_s12 + $0x78] sm:$0xff] %v833_v30  ;;  %v578_v42 = vmul.f32 %v1128_v22, %v1521_v6  ;;  %v773_v43 = vmul.f32 %v1193_v27, %v1527_v11  ;;  %v1197_v10 = vld [vmem:[%s1507_s10 + $0x6b8] sm:$0xff]  ;;  %v1133_v18 = vld [vmem:[%s1507_s10 + $0x4c0] sm:$0xff]  ;;  %v192_v24 = vld [vmem:[%s1507_s10 + $0xc8] sm:$0xff] }
  0x64   : > { %v253_v44 = vmul.f32 %v1514_v1, %v187_v28  ;;  %v384_v45 = vmul.f32 %v1064_v29, %v1519_v5  ;;  %v641_v49 = vadd.f32 %v577_v31, %v446_v37  ;;  %v447_v50 = vadd.f32 %v383_v38, %v252_v33  ;;  %v1198_v23 = vld [vmem:[%s1507_s10 + $0x6c0] sm:$0xff]  ;;  %v1134_v30 = vld [vmem:[%s1507_s10 + $0x4c8] sm:$0xff]  ;;  %v1070_v37 = vld [vmem:[%s1507_s10 + $0x2d0] sm:$0xff] }
  0x65   : > { %898 = vst [vmem:[%s1574_s12 + $0x80] sm:$0xff] %v834_v35  ;;  %v835_v48 = vadd.f32 %v771_v20, %v640_v36  ;;  %v579_v51 = vmul.f32 %v1129_v34, %v1521_v6  ;;  %v774_v55 = vmul.f32 %v1194_v39, %v1527_v11  ;;  %v254_v56 = vmul.f32 %v1514_v1, %v188_v40  ;;  %v1199_v31 = vld [vmem:[%s1507_s10 + $0x6c8] sm:$0xff]  ;;  %v193_v36 = vld [vmem:[%s1507_s10 + $0xd0] sm:$0xff] }
  0x66   : > { %v448_v54 = vadd.f32 %v384_v45, %v253_v44  ;;  %v385_v57 = vmul.f32 %v1065_v41, %v1519_v5  ;;  %v836_v61 = vadd.f32 %v772_v32, %v641_v49  ;;  %v642_v62 = vadd.f32 %v578_v42, %v447_v50  ;;  %v1135_v42 = vld [vmem:[%s1507_s10 + $0x4d0] sm:$0xff]  ;;  %v194_v44 = vld [vmem:[%s1507_s10 + $0xd8] sm:$0xff] }
  0x67   : > { %899 = vst [vmem:[%s1574_s12 + $0x88] sm:$0xff] %v835_v48  ;;  %v580_v63 = vmul.f32 %v1130_v46, %v1521_v6  ;;  %v775_v0 = vmul.f32 %v1195_v47, %v1527_v11  ;;  %v255_v8 = vmul.f32 %v1514_v1, %v189_v52  ;;  %v386_v9 = vmul.f32 %v1066_v53, %v1519_v5  ;;  %v1071_v49 = vld [vmem:[%s1507_s10 + $0x2d8] sm:$0xff] }
  0x68   : > { %v643_v4 = vadd.f32 %v579_v51, %v448_v54  ;;  %v449_v7 = vadd.f32 %v385_v57, %v254_v56  ;;  %900 = vst [vmem:[%s1574_s12 + $0x90] sm:$0xff] %v836_v61  ;;  %v837_v14 = vadd.f32 %v773_v43, %v642_v62  ;;  %v581_v15 = vmul.f32 %v1131_v58, %v1521_v6  ;;  %v1200_v43 = vld [vmem:[%s1507_s10 + $0x6d0] sm:$0xff]  ;;  %v1136_v50 = vld [vmem:[%s1507_s10 + $0x4d8] sm:$0xff]  ;;  %v195_v56 = vld [vmem:[%s1507_s10 + $0xe0] sm:$0xff] }
  0x69   : > { %v776_v16 = vmul.f32 %v1196_v59, %v1527_v11  ;;  %v256_v17 = vmul.f32 %v1514_v1, %v190_v60  ;;  %v450_v21 = vadd.f32 %v386_v9, %v255_v8  ;;  %v387_v22 = vmul.f32 %v1067_v2, %v1519_v5  ;;  %v1072_v57 = vld [vmem:[%s1507_s10 + $0x2e0] sm:$0xff]  ;;  %v1073_v8 = vld [vmem:[%s1507_s10 + $0x2e8] sm:$0xff] }
  0x6a   : > { %v838_v19 = vadd.f32 %v774_v55, %v643_v4  ;;  %v644_v20 = vadd.f32 %v580_v63, %v449_v7  ;;  %901 = vst [vmem:[%s1574_s12 + $0x98] sm:$0xff] %v837_v14  ;;  %v582_v26 = vmul.f32 %v1132_v3, %v1521_v6  ;;  %v777_v27 = vmul.f32 %v1197_v10, %v1527_v11  ;;  %v1201_v55 = vld [vmem:[%s1507_s10 + $0x6d8] sm:$0xff]  ;;  %v1137_v62 = vld [vmem:[%s1507_s10 + $0x4e0] sm:$0xff]  ;;  %v196_v7 = vld [vmem:[%s1507_s10 + $0xe8] sm:$0xff] }
  0x6b   : > { %v257_v28 = vmul.f32 %v1514_v1, %v191_v12  ;;  %v388_v29 = vmul.f32 %v1068_v13, %v1519_v5  ;;  %v645_v33 = vadd.f32 %v581_v15, %v450_v21  ;;  %v451_v34 = vadd.f32 %v387_v22, %v256_v17  ;;  %v1202_v4 = vld [vmem:[%s1507_s10 + $0x6e0] sm:$0xff]  ;;  %v1138_v14 = vld [vmem:[%s1507_s10 + $0x4e8] sm:$0xff]  ;;  %v1074_v21 = vld [vmem:[%s1507_s10 + $0x2f0] sm:$0xff] }
  0x6c   : > { %902 = vst [vmem:[%s1574_s12 + $0xa0] sm:$0xff] %v838_v19  ;;  %v839_v32 = vadd.f32 %v775_v0, %v644_v20  ;;  %v583_v35 = vmul.f32 %v1133_v18, %v1521_v6  ;;  %v778_v39 = vmul.f32 %v1198_v23, %v1527_v11  ;;  %v258_v40 = vmul.f32 %v1514_v1, %v192_v24  ;;  %v1203_v15 = vld [vmem:[%s1507_s10 + $0x6e8] sm:$0xff]  ;;  %v197_v20 = vld [vmem:[%s1507_s10 + $0xf0] sm:$0xff] }
  0x6d   : > { %v452_v38 = vadd.f32 %v388_v29, %v257_v28  ;;  %v389_v41 = vmul.f32 %v1069_v25, %v1519_v5  ;;  %v840_v45 = vadd.f32 %v776_v16, %v645_v33  ;;  %v646_v46 = vadd.f32 %v582_v26, %v451_v34  ;;  %v1139_v26 = vld [vmem:[%s1507_s10 + $0x4f0] sm:$0xff]  ;;  %v198_v28 = vld [vmem:[%s1507_s10 + $0xf8] sm:$0xff] }
  0x6e   : > { %903 = vst [vmem:[%s1574_s12 + $0xa8] sm:$0xff] %v839_v32  ;;  %v584_v47 = vmul.f32 %v1134_v30, %v1521_v6  ;;  %v779_v48 = vmul.f32 %v1199_v31, %v1527_v11  ;;  %v259_v53 = vmul.f32 %v1514_v1, %v193_v36  ;;  %v390_v54 = vmul.f32 %v1070_v37, %v1519_v5  ;;  %v1075_v33 = vld [vmem:[%s1507_s10 + $0x2f8] sm:$0xff] }
  0x6f   : > { %v647_v51 = vadd.f32 %v583_v35, %v452_v38  ;;  %v453_v52 = vadd.f32 %v389_v41, %v258_v40  ;;  %904 = vst [vmem:[%s1574_s12 + $0xb0] sm:$0xff] %v840_v45  ;;  %v841_v58 = vadd.f32 %v777_v27, %v646_v46  ;;  %v585_v59 = vmul.f32 %v1135_v42, %v1521_v6  ;;  %v1204_v27 = vld [vmem:[%s1507_s10 + $0x6f0] sm:$0xff]  ;;  %v1140_v34 = vld [vmem:[%s1507_s10 + $0x4f8] sm:$0xff]  ;;  %v199_v40 = vld [vmem:[%s1507_s10 + $0x100] sm:$0xff] }
  0x70   : > { %v780_v60 = vmul.f32 %v1200_v43, %v1527_v11  ;;  %v260_v61 = vmul.f32 %v1514_v1, %v194_v44  ;;  %v454_v2 = vadd.f32 %v390_v54, %v259_v53  ;;  %v391_v3 = vmul.f32 %v1071_v49, %v1519_v5  ;;  %v1076_v41 = vld [vmem:[%s1507_s10 + $0x300] sm:$0xff]  ;;  %v1077_v53 = vld [vmem:[%s1507_s10 + $0x308] sm:$0xff] }
  0x71   : > { %v842_v63 = vadd.f32 %v778_v39, %v647_v51  ;;  %v648_v0 = vadd.f32 %v584_v47, %v453_v52  ;;  %905 = vst [vmem:[%s1574_s12 + $0xb8] sm:$0xff] %v841_v58  ;;  %v586_v9 = vmul.f32 %v1136_v50, %v1521_v6  ;;  %v781_v10 = vmul.f32 %v1201_v55, %v1527_v11  ;;  %v1205_v39 = vld [vmem:[%s1507_s10 + $0x6f8] sm:$0xff]  ;;  %v1141_v46 = vld [vmem:[%s1507_s10 + $0x500] sm:$0xff]  ;;  %v200_v52 = vld [vmem:[%s1507_s10 + $0x108] sm:$0xff] }
  0x72   : > { %v261_v12 = vmul.f32 %v1514_v1, %v195_v56  ;;  %v392_v13 = vmul.f32 %v1072_v57, %v1519_v5  ;;  %v649_v17 = vadd.f32 %v585_v59, %v454_v2  ;;  %v455_v18 = vadd.f32 %v391_v3, %v260_v61  ;;  %v1206_v51 = vld [vmem:[%s1507_s10 + $0x700] sm:$0xff]  ;;  %v1142_v58 = vld [vmem:[%s1507_s10 + $0x508] sm:$0xff]  ;;  %v1078_v2 = vld [vmem:[%s1507_s10 + $0x310] sm:$0xff] }
  0x73   : > { %906 = vst [vmem:[%s1574_s12 + $0xc0] sm:$0xff] %v842_v63  ;;  %v843_v16 = vadd.f32 %v779_v48, %v648_v0  ;;  %v587_v19 = vmul.f32 %v1137_v62, %v1521_v6  ;;  %v782_v23 = vmul.f32 %v1202_v4, %v1527_v11  ;;  %v262_v24 = vmul.f32 %v1514_v1, %v196_v7  ;;  %v1207_v59 = vld [vmem:[%s1507_s10 + $0x708] sm:$0xff]  ;;  %v201_v0 = vld [vmem:[%s1507_s10 + $0x110] sm:$0xff] }
  0x74   : > { %v456_v22 = vadd.f32 %v392_v13, %v261_v12  ;;  %v393_v25 = vmul.f32 %v1073_v8, %v1519_v5  ;;  %v844_v29 = vadd.f32 %v780_v60, %v649_v17  ;;  %v650_v30 = vadd.f32 %v586_v9, %v455_v18  ;;  %v1143_v9 = vld [vmem:[%s1507_s10 + $0x510] sm:$0xff]  ;;  %v202_v12 = vld [vmem:[%s1507_s10 + $0x118] sm:$0xff] }
  0x75   : > { %907 = vst [vmem:[%s1574_s12 + $0xc8] sm:$0xff] %v843_v16  ;;  %v588_v31 = vmul.f32 %v1138_v14, %v1521_v6  ;;  %v783_v32 = vmul.f32 %v1203_v15, %v1527_v11  ;;  %v263_v37 = vmul.f32 %v1514_v1, %v197_v20  ;;  %v394_v38 = vmul.f32 %v1074_v21, %v1519_v5  ;;  %v1079_v17 = vld [vmem:[%s1507_s10 + $0x318] sm:$0xff] }
  0x76   : > { %v651_v35 = vadd.f32 %v587_v19, %v456_v22  ;;  %v457_v36 = vadd.f32 %v393_v25, %v262_v24  ;;  %908 = vst [vmem:[%s1574_s12 + $0xd0] sm:$0xff] %v844_v29  ;;  %v845_v42 = vadd.f32 %v781_v10, %v650_v30  ;;  %v589_v43 = vmul.f32 %v1139_v26, %v1521_v6  ;;  %v1208_v10 = vld [vmem:[%s1507_s10 + $0x710] sm:$0xff]  ;;  %v1144_v18 = vld [vmem:[%s1507_s10 + $0x518] sm:$0xff]  ;;  %v203_v24 = vld [vmem:[%s1507_s10 + $0x120] sm:$0xff] }
  0x77   : > { %v784_v44 = vmul.f32 %v1204_v27, %v1527_v11  ;;  %v264_v45 = vmul.f32 %v1514_v1, %v198_v28  ;;  %v458_v49 = vadd.f32 %v394_v38, %v263_v37  ;;  %v395_v50 = vmul.f32 %v1075_v33, %v1519_v5  ;;  %v1080_v25 = vld [vmem:[%s1507_s10 + $0x320] sm:$0xff]  ;;  %v1081_v37 = vld [vmem:[%s1507_s10 + $0x328] sm:$0xff] }
  0x78   : > { %v846_v47 = vadd.f32 %v782_v23, %v651_v35  ;;  %v652_v48 = vadd.f32 %v588_v31, %v457_v36  ;;  %909 = vst [vmem:[%s1574_s12 + $0xd8] sm:$0xff] %v845_v42  ;;  %v590_v54 = vmul.f32 %v1140_v34, %v1521_v6  ;;  %v785_v55 = vmul.f32 %v1205_v39, %v1527_v11  ;;  %v1209_v23 = vld [vmem:[%s1507_s10 + $0x718] sm:$0xff]  ;;  %v1145_v30 = vld [vmem:[%s1507_s10 + $0x520] sm:$0xff]  ;;  %v204_v36 = vld [vmem:[%s1507_s10 + $0x128] sm:$0xff] }
  0x79   : > { %v265_v56 = vmul.f32 %v1514_v1, %v199_v40  ;;  %v396_v57 = vmul.f32 %v1076_v41, %v1519_v5  ;;  %v653_v61 = vadd.f32 %v589_v43, %v458_v49  ;;  %v459_v62 = vadd.f32 %v395_v50, %v264_v45  ;;  %v1210_v35 = vld [vmem:[%s1507_s10 + $0x720] sm:$0xff]  ;;  %v1146_v42 = vld [vmem:[%s1507_s10 + $0x528] sm:$0xff]  ;;  %v1082_v49 = vld [vmem:[%s1507_s10 + $0x330] sm:$0xff] }
  0x7a   : > { %910 = vst [vmem:[%s1574_s12 + $0xe0] sm:$0xff] %v846_v47  ;;  %v847_v60 = vadd.f32 %v783_v32, %v652_v48  ;;  %v591_v63 = vmul.f32 %v1141_v46, %v1521_v6  ;;  %v786_v4 = vmul.f32 %v1206_v51, %v1527_v11  ;;  %v266_v7 = vmul.f32 %v1514_v1, %v200_v52  ;;  %v1211_v43 = vld [vmem:[%s1507_s10 + $0x728] sm:$0xff]  ;;  %v205_v48 = vld [vmem:[%s1507_s10 + $0x130] sm:$0xff] }
  0x7b   : > { %v460_v3 = vadd.f32 %v396_v57, %v265_v56  ;;  %v397_v8 = vmul.f32 %v1077_v53, %v1519_v5  ;;  %v848_v13 = vadd.f32 %v784_v44, %v653_v61  ;;  %v654_v14 = vadd.f32 %v590_v54, %v459_v62  ;;  %v1147_v54 = vld [vmem:[%s1507_s10 + $0x530] sm:$0xff]  ;;  %v206_v56 = vld [vmem:[%s1507_s10 + $0x138] sm:$0xff] }
  0x7c   : > { %911 = vst [vmem:[%s1574_s12 + $0xe8] sm:$0xff] %v847_v60  ;;  %v592_v15 = vmul.f32 %v1142_v58, %v1521_v6  ;;  %v787_v16 = vmul.f32 %v1207_v59, %v1527_v11  ;;  %v267_v21 = vmul.f32 %v1514_v1, %v201_v0  ;;  %v398_v22 = vmul.f32 %v1078_v2, %v1519_v5  ;;  %v1083_v61 = vld [vmem:[%s1507_s10 + $0x338] sm:$0xff] }
  0x7d   : > { %v655_v19 = vadd.f32 %v591_v63, %v460_v3  ;;  %v461_v20 = vadd.f32 %v397_v8, %v266_v7  ;;  %912 = vst [vmem:[%s1574_s12 + $0xf0] sm:$0xff] %v848_v13  ;;  %v849_v26 = vadd.f32 %v785_v55, %v654_v14  ;;  %v593_v27 = vmul.f32 %v1143_v9, %v1521_v6  ;;  %v1212_v55 = vld [vmem:[%s1507_s10 + $0x730] sm:$0xff]  ;;  %v1148_v62 = vld [vmem:[%s1507_s10 + $0x538] sm:$0xff]  ;;  %v207_v7 = vld [vmem:[%s1507_s10 + $0x140] sm:$0xff] }
  0x7e   : > { %v788_v28 = vmul.f32 %v1208_v10, %v1527_v11  ;;  %v268_v29 = vmul.f32 %v1514_v1, %v202_v12  ;;  %v462_v33 = vadd.f32 %v398_v22, %v267_v21  ;;  %v399_v34 = vmul.f32 %v1079_v17, %v1519_v5  ;;  %v1084_v8 = vld [vmem:[%s1507_s10 + $0x340] sm:$0xff]  ;;  %v1085_v21 = vld [vmem:[%s1507_s10 + $0x348] sm:$0xff] }
  0x7f   : > { %v850_v31 = vadd.f32 %v786_v4, %v655_v19  ;;  %v656_v32 = vadd.f32 %v592_v15, %v461_v20  ;;  %913 = vst [vmem:[%s1574_s12 + $0xf8] sm:$0xff] %v849_v26  ;;  %v594_v38 = vmul.f32 %v1144_v18, %v1521_v6  ;;  %v789_v39 = vmul.f32 %v1209_v23, %v1527_v11  ;;  %v1213_v4 = vld [vmem:[%s1507_s10 + $0x738] sm:$0xff]  ;;  %v1149_v14 = vld [vmem:[%s1507_s10 + $0x540] sm:$0xff]  ;;  %v208_v20 = vld [vmem:[%s1507_s10 + $0x148] sm:$0xff] }
  0x80   : > { %v269_v40 = vmul.f32 %v1514_v1, %v203_v24  ;;  %v400_v41 = vmul.f32 %v1080_v25, %v1519_v5  ;;  %v657_v45 = vadd.f32 %v593_v27, %v462_v33  ;;  %v463_v46 = vadd.f32 %v399_v34, %v268_v29  ;;  %v1214_v19 = vld [vmem:[%s1507_s10 + $0x740] sm:$0xff]  ;;  %v1150_v26 = vld [vmem:[%s1507_s10 + $0x548] sm:$0xff]  ;;  %v1086_v33 = vld [vmem:[%s1507_s10 + $0x350] sm:$0xff] }
  0x81   : > { %914 = vst [vmem:[%s1574_s12 + $0x100] sm:$0xff] %v850_v31  ;;  %v851_v44 = vadd.f32 %v787_v16, %v656_v32  ;;  %v595_v47 = vmul.f32 %v1145_v30, %v1521_v6  ;;  %v790_v51 = vmul.f32 %v1210_v35, %v1527_v11  ;;  %v270_v52 = vmul.f32 %v1514_v1, %v204_v36  ;;  %v1215_v27 = vld [vmem:[%s1507_s10 + $0x748] sm:$0xff]  ;;  %v209_v32 = vld [vmem:[%s1507_s10 + $0x150] sm:$0xff] }
  0x82   : > { %v464_v50 = vadd.f32 %v400_v41, %v269_v40  ;;  %v401_v53 = vmul.f32 %v1081_v37, %v1519_v5  ;;  %v852_v57 = vadd.f32 %v788_v28, %v657_v45  ;;  %v658_v58 = vadd.f32 %v594_v38, %v463_v46  ;;  %v1151_v38 = vld [vmem:[%s1507_s10 + $0x550] sm:$0xff]  ;;  %v210_v40 = vld [vmem:[%s1507_s10 + $0x158] sm:$0xff] }
  0x83   : > { %915 = vst [vmem:[%s1574_s12 + $0x108] sm:$0xff] %v851_v44  ;;  %v596_v59 = vmul.f32 %v1146_v42, %v1521_v6  ;;  %v791_v60 = vmul.f32 %v1211_v43, %v1527_v11  ;;  %v271_v2 = vmul.f32 %v1514_v1, %v205_v48  ;;  %v402_v3 = vmul.f32 %v1082_v49, %v1519_v5  ;;  %v1087_v45 = vld [vmem:[%s1507_s10 + $0x358] sm:$0xff] }
  0x84   : > { %v659_v63 = vadd.f32 %v595_v47, %v464_v50  ;;  %v465_v0 = vadd.f32 %v401_v53, %v270_v52  ;;  %916 = vst [vmem:[%s1574_s12 + $0x110] sm:$0xff] %v852_v57  ;;  %v853_v9 = vadd.f32 %v789_v39, %v658_v58  ;;  %v597_v10 = vmul.f32 %v1147_v54, %v1521_v6  ;;  %v1216_v39 = vld [vmem:[%s1507_s10 + $0x750] sm:$0xff]  ;;  %v1152_v46 = vld [vmem:[%s1507_s10 + $0x558] sm:$0xff]  ;;  %v211_v52 = vld [vmem:[%s1507_s10 + $0x160] sm:$0xff] }
  0x85   : > { %v792_v12 = vmul.f32 %v1212_v55, %v1527_v11  ;;  %v272_v13 = vmul.f32 %v1514_v1, %v206_v56  ;;  %v466_v17 = vadd.f32 %v402_v3, %v271_v2  ;;  %v403_v18 = vmul.f32 %v1083_v61, %v1519_v5  ;;  %v1088_v53 = vld [vmem:[%s1507_s10 + $0x360] sm:$0xff]  ;;  %v1089_v2 = vld [vmem:[%s1507_s10 + $0x368] sm:$0xff] }
  0x86   : > { %v854_v15 = vadd.f32 %v790_v51, %v659_v63  ;;  %v660_v16 = vadd.f32 %v596_v59, %v465_v0  ;;  %917 = vst [vmem:[%s1574_s12 + $0x118] sm:$0xff] %v853_v9  ;;  %v598_v22 = vmul.f32 %v1148_v62, %v1521_v6  ;;  %v793_v23 = vmul.f32 %v1213_v4, %v1527_v11  ;;  %v1217_v51 = vld [vmem:[%s1507_s10 + $0x758] sm:$0xff]  ;;  %v1153_v58 = vld [vmem:[%s1507_s10 + $0x560] sm:$0xff]  ;;  %v212_v0 = vld [vmem:[%s1507_s10 + $0x168] sm:$0xff] }
  0x87   : > { %v273_v24 = vmul.f32 %v1514_v1, %v207_v7  ;;  %v404_v25 = vmul.f32 %v1084_v8, %v1519_v5  ;;  %v661_v29 = vadd.f32 %v597_v10, %v466_v17  ;;  %v467_v30 = vadd.f32 %v403_v18, %v272_v13  ;;  %v1218_v63 = vld [vmem:[%s1507_s10 + $0x760] sm:$0xff]  ;;  %v1154_v9 = vld [vmem:[%s1507_s10 + $0x568] sm:$0xff]  ;;  %v1090_v17 = vld [vmem:[%s1507_s10 + $0x370] sm:$0xff] }
  0x88   : > { %918 = vst [vmem:[%s1574_s12 + $0x120] sm:$0xff] %v854_v15  ;;  %v855_v28 = vadd.f32 %v791_v60, %v660_v16  ;;  %v599_v31 = vmul.f32 %v1149_v14, %v1521_v6  ;;  %v794_v35 = vmul.f32 %v1214_v19, %v1527_v11  ;;  %v274_v36 = vmul.f32 %v1514_v1, %v208_v20  ;;  %v1219_v10 = vld [vmem:[%s1507_s10 + $0x768] sm:$0xff]  ;;  %v213_v16 = vld [vmem:[%s1507_s10 + $0x170] sm:$0xff] }
  0x89   : > { %v468_v34 = vadd.f32 %v404_v25, %v273_v24  ;;  %v405_v37 = vmul.f32 %v1085_v21, %v1519_v5  ;;  %v856_v41 = vadd.f32 %v792_v12, %v661_v29  ;;  %v662_v42 = vadd.f32 %v598_v22, %v467_v30  ;;  %v1155_v22 = vld [vmem:[%s1507_s10 + $0x570] sm:$0xff]  ;;  %v214_v24 = vld [vmem:[%s1507_s10 + $0x178] sm:$0xff] }
  0x8a   : > { %919 = vst [vmem:[%s1574_s12 + $0x128] sm:$0xff] %v855_v28  ;;  %v600_v43 = vmul.f32 %v1150_v26, %v1521_v6  ;;  %v795_v44 = vmul.f32 %v1215_v27, %v1527_v11  ;;  %v275_v49 = vmul.f32 %v1514_v1, %v209_v32  ;;  %v406_v50 = vmul.f32 %v1086_v33, %v1519_v5  ;;  %v1091_v29 = vld [vmem:[%s1507_s10 + $0x378] sm:$0xff] }
  0x8b   : > { %v663_v47 = vadd.f32 %v599_v31, %v468_v34  ;;  %v469_v48 = vadd.f32 %v405_v37, %v274_v36  ;;  %920 = vst [vmem:[%s1574_s12 + $0x130] sm:$0xff] %v856_v41  ;;  %v857_v54 = vadd.f32 %v793_v23, %v662_v42  ;;  %v601_v55 = vmul.f32 %v1151_v38, %v1521_v6  ;;  %v1220_v23 = vld [vmem:[%s1507_s10 + $0x770] sm:$0xff]  ;;  %v1156_v30 = vld [vmem:[%s1507_s10 + $0x578] sm:$0xff]  ;;  %v215_v36 = vld [vmem:[%s1507_s10 + $0x180] sm:$0xff] }
  0x8c   : > { %v796_v56 = vmul.f32 %v1216_v39, %v1527_v11  ;;  %v276_v57 = vmul.f32 %v1514_v1, %v210_v40  ;;  %v470_v61 = vadd.f32 %v406_v50, %v275_v49  ;;  %v407_v62 = vmul.f32 %v1087_v45, %v1519_v5  ;;  %v1092_v37 = vld [vmem:[%s1507_s10 + $0x380] sm:$0xff]  ;;  %v1093_v49 = vld [vmem:[%s1507_s10 + $0x388] sm:$0xff] }
  0x8d   : > { %v858_v59 = vadd.f32 %v794_v35, %v663_v47  ;;  %v664_v60 = vadd.f32 %v600_v43, %v469_v48  ;;  %921 = vst [vmem:[%s1574_s12 + $0x138] sm:$0xff] %v857_v54  ;;  %v602_v3 = vmul.f32 %v1152_v46, %v1521_v6  ;;  %v797_v4 = vmul.f32 %v1217_v51, %v1527_v11  ;;  %v1221_v35 = vld [vmem:[%s1507_s10 + $0x778] sm:$0xff]  ;;  %v1157_v42 = vld [vmem:[%s1507_s10 + $0x580] sm:$0xff]  ;;  %v216_v48 = vld [vmem:[%s1507_s10 + $0x188] sm:$0xff] }
  0x8e   : > { %v277_v7 = vmul.f32 %v1514_v1, %v211_v52  ;;  %v408_v8 = vmul.f32 %v1088_v53, %v1519_v5  ;;  %v665_v13 = vadd.f32 %v601_v55, %v470_v61  ;;  %v471_v14 = vadd.f32 %v407_v62, %v276_v57  ;;  %v1222_v47 = vld [vmem:[%s1507_s10 + $0x780] sm:$0xff]  ;;  %v1158_v54 = vld [vmem:[%s1507_s10 + $0x588] sm:$0xff]  ;;  %v1094_v61 = vld [vmem:[%s1507_s10 + $0x390] sm:$0xff] }
  0x8f   : > { %922 = vst [vmem:[%s1574_s12 + $0x140] sm:$0xff] %v858_v59  ;;  %v859_v12 = vadd.f32 %v795_v44, %v664_v60  ;;  %v603_v15 = vmul.f32 %v1153_v58, %v1521_v6  ;;  %v798_v19 = vmul.f32 %v1218_v63, %v1527_v11  ;;  %v278_v20 = vmul.f32 %v1514_v1, %v212_v0  ;;  %v1223_v55 = vld [vmem:[%s1507_s10 + $0x788] sm:$0xff]  ;;  %v217_v60 = vld [vmem:[%s1507_s10 + $0x190] sm:$0xff] }
  0x90   : > { %v472_v18 = vadd.f32 %v408_v8, %v277_v7  ;;  %v409_v21 = vmul.f32 %v1089_v2, %v1519_v5  ;;  %v860_v25 = vadd.f32 %v796_v56, %v665_v13  ;;  %v666_v26 = vadd.f32 %v602_v3, %v471_v14  ;;  %v1159_v3 = vld [vmem:[%s1507_s10 + $0x590] sm:$0xff]  ;;  %v218_v7 = vld [vmem:[%s1507_s10 + $0x198] sm:$0xff] }
  0x91   : > { %923 = vst [vmem:[%s1574_s12 + $0x148] sm:$0xff] %v859_v12  ;;  %v604_v27 = vmul.f32 %v1154_v9, %v1521_v6  ;;  %v799_v28 = vmul.f32 %v1219_v10, %v1527_v11  ;;  %v279_v33 = vmul.f32 %v1514_v1, %v213_v16  ;;  %v410_v34 = vmul.f32 %v1090_v17, %v1519_v5  ;;  %v1095_v13 = vld [vmem:[%s1507_s10 + $0x398] sm:$0xff] }
  0x92   : > { %v667_v31 = vadd.f32 %v603_v15, %v472_v18  ;;  %v473_v32 = vadd.f32 %v409_v21, %v278_v20  ;;  %924 = vst [vmem:[%s1574_s12 + $0x150] sm:$0xff] %v860_v25  ;;  %v861_v38 = vadd.f32 %v797_v4, %v666_v26  ;;  %v605_v39 = vmul.f32 %v1155_v22, %v1521_v6  ;;  %v1224_v4 = vld [vmem:[%s1507_s10 + $0x790] sm:$0xff]  ;;  %v1160_v14 = vld [vmem:[%s1507_s10 + $0x598] sm:$0xff]  ;;  %v219_v20 = vld [vmem:[%s1507_s10 + $0x1a0] sm:$0xff] }
  0x93   : > { %v800_v40 = vmul.f32 %v1220_v23, %v1527_v11  ;;  %v280_v41 = vmul.f32 %v1514_v1, %v214_v24  ;;  %v474_v45 = vadd.f32 %v410_v34, %v279_v33  ;;  %v411_v46 = vmul.f32 %v1091_v29, %v1519_v5  ;;  %v1096_v21 = vld [vmem:[%s1507_s10 + $0x3a0] sm:$0xff]  ;;  %v1097_v33 = vld [vmem:[%s1507_s10 + $0x3a8] sm:$0xff] }
  0x94   : > { %v862_v43 = vadd.f32 %v798_v19, %v667_v31  ;;  %v668_v44 = vadd.f32 %v604_v27, %v473_v32  ;;  %925 = vst [vmem:[%s1574_s12 + $0x158] sm:$0xff] %v861_v38  ;;  %v606_v50 = vmul.f32 %v1156_v30, %v1521_v6  ;;  %v801_v51 = vmul.f32 %v1221_v35, %v1527_v11  ;;  %v1225_v19 = vld [vmem:[%s1507_s10 + $0x798] sm:$0xff]  ;;  %v1161_v26 = vld [vmem:[%s1507_s10 + $0x5a0] sm:$0xff]  ;;  %v220_v32 = vld [vmem:[%s1507_s10 + $0x1a8] sm:$0xff] }
  0x95   : > { %v281_v52 = vmul.f32 %v1514_v1, %v215_v36  ;;  %v412_v53 = vmul.f32 %v1092_v37, %v1519_v5  ;;  %v669_v57 = vadd.f32 %v605_v39, %v474_v45  ;;  %v475_v58 = vadd.f32 %v411_v46, %v280_v41  ;;  %v1226_v31 = vld [vmem:[%s1507_s10 + $0x7a0] sm:$0xff]  ;;  %v1162_v38 = vld [vmem:[%s1507_s10 + $0x5a8] sm:$0xff]  ;;  %v1098_v45 = vld [vmem:[%s1507_s10 + $0x3b0] sm:$0xff] }
  0x96   : > { %926 = vst [vmem:[%s1574_s12 + $0x160] sm:$0xff] %v862_v43  ;;  %v863_v56 = vadd.f32 %v799_v28, %v668_v44  ;;  %v607_v59 = vmul.f32 %v1157_v42, %v1521_v6  ;;  %v802_v63 = vmul.f32 %v1222_v47, %v1527_v11  ;;  %v282_v0 = vmul.f32 %v1514_v1, %v216_v48  ;;  %v1227_v39 = vld [vmem:[%s1507_s10 + $0x7a8] sm:$0xff]  ;;  %v221_v44 = vld [vmem:[%s1507_s10 + $0x1b0] sm:$0xff] }
  0x97   : > { %v476_v62 = vadd.f32 %v412_v53, %v281_v52  ;;  %v413_v2 = vmul.f32 %v1093_v49, %v1519_v5  ;;  %v864_v8 = vadd.f32 %v800_v40, %v669_v57  ;;  %v670_v9 = vadd.f32 %v606_v50, %v475_v58  ;;  %v1163_v50 = vld [vmem:[%s1507_s10 + $0x5b0] sm:$0xff]  ;;  %v222_v52 = vld [vmem:[%s1507_s10 + $0x1b8] sm:$0xff] }
  0x98   : > { %927 = vst [vmem:[%s1574_s12 + $0x168] sm:$0xff] %v863_v56  ;;  %v608_v10 = vmul.f32 %v1158_v54, %v1521_v6  ;;  %v803_v12 = vmul.f32 %v1223_v55, %v1527_v11  ;;  %v283_v17 = vmul.f32 %v1514_v1, %v217_v60  ;;  %v414_v18 = vmul.f32 %v1094_v61, %v1519_v5  ;;  %v1099_v57 = vld [vmem:[%s1507_s10 + $0x3b8] sm:$0xff] }
  0x99   : > { %v671_v15 = vadd.f32 %v607_v59, %v476_v62  ;;  %v477_v16 = vadd.f32 %v413_v2, %v282_v0  ;;  %928 = vst [vmem:[%s1574_s12 + $0x170] sm:$0xff] %v864_v8  ;;  %v865_v22 = vadd.f32 %v801_v51, %v670_v9  ;;  %v609_v23 = vmul.f32 %v1159_v3, %v1521_v6  ;;  %v1228_v51 = vld [vmem:[%s1507_s10 + $0x7b0] sm:$0xff]  ;;  %v1164_v58 = vld [vmem:[%s1507_s10 + $0x5b8] sm:$0xff]  ;;  %v223_v0 = vld [vmem:[%s1507_s10 + $0x1c0] sm:$0xff] }
  0x9a   : > { %v804_v24 = vmul.f32 %v1224_v4, %v1527_v11  ;;  %v284_v25 = vmul.f32 %v1514_v1, %v218_v7  ;;  %v478_v29 = vadd.f32 %v414_v18, %v283_v17  ;;  %v415_v30 = vmul.f32 %v1095_v13, %v1519_v5  ;;  %v1100_v2 = vld [vmem:[%s1507_s10 + $0x3c0] sm:$0xff]  ;;  %v1101_v17 = vld [vmem:[%s1507_s10 + $0x3c8] sm:$0xff] }
  0x9b   : > { %v866_v27 = vadd.f32 %v802_v63, %v671_v15  ;;  %v672_v28 = vadd.f32 %v608_v10, %v477_v16  ;;  %929 = vst [vmem:[%s1574_s12 + $0x178] sm:$0xff] %v865_v22  ;;  %v610_v34 = vmul.f32 %v1160_v14, %v1521_v6  ;;  %v805_v35 = vmul.f32 %v1225_v19, %v1527_v11  ;;  %v1229_v63 = vld [vmem:[%s1507_s10 + $0x7b8] sm:$0xff]  ;;  %v1165_v9 = vld [vmem:[%s1507_s10 + $0x5c0] sm:$0xff]  ;;  %v224_v16 = vld [vmem:[%s1507_s10 + $0x1c8] sm:$0xff] }
  0x9c   : > { %v285_v36 = vmul.f32 %v1514_v1, %v219_v20  ;;  %v416_v37 = vmul.f32 %v1096_v21, %v1519_v5  ;;  %v673_v41 = vadd.f32 %v609_v23, %v478_v29  ;;  %v479_v42 = vadd.f32 %v415_v30, %v284_v25  ;;  %v1230_v15 = vld [vmem:[%s1507_s10 + $0x7c0] sm:$0xff]  ;;  %v1166_v22 = vld [vmem:[%s1507_s10 + $0x5c8] sm:$0xff]  ;;  %v1102_v29 = vld [vmem:[%s1507_s10 + $0x3d0] sm:$0xff] }
  0x9d   : > { %930 = vst [vmem:[%s1574_s12 + $0x180] sm:$0xff] %v866_v27  ;;  %v867_v40 = vadd.f32 %v803_v12, %v672_v28  ;;  %v611_v43 = vmul.f32 %v1161_v26, %v1521_v6  ;;  %v806_v47 = vmul.f32 %v1226_v31, %v1527_v11  ;;  %v286_v48 = vmul.f32 %v1514_v1, %v220_v32  ;;  %v1231_v23 = vld [vmem:[%s1507_s10 + $0x7c8] sm:$0xff]  ;;  %v225_v28 = vld [vmem:[%s1507_s10 + $0x1d0] sm:$0xff] }
  0x9e   : > { %v480_v46 = vadd.f32 %v416_v37, %v285_v36  ;;  %v417_v49 = vmul.f32 %v1097_v33, %v1519_v5  ;;  %v868_v53 = vadd.f32 %v804_v24, %v673_v41  ;;  %v674_v54 = vadd.f32 %v610_v34, %v479_v42  ;;  %v1167_v34 = vld [vmem:[%s1507_s10 + $0x5d0] sm:$0xff]  ;;  %v226_v36 = vld [vmem:[%s1507_s10 + $0x1d8] sm:$0xff] }
  0x9f   : > { %931 = vst [vmem:[%s1574_s12 + $0x188] sm:$0xff] %v867_v40  ;;  %v612_v55 = vmul.f32 %v1162_v38, %v1521_v6  ;;  %v807_v56 = vmul.f32 %v1227_v39, %v1527_v11  ;;  %v287_v61 = vmul.f32 %v1514_v1, %v221_v44  ;;  %v418_v62 = vmul.f32 %v1098_v45, %v1519_v5  ;;  %v1103_v41 = vld [vmem:[%s1507_s10 + $0x3d8] sm:$0xff] }
  0xa0   : > { %v675_v59 = vadd.f32 %v611_v43, %v480_v46  ;;  %v481_v60 = vadd.f32 %v417_v49, %v286_v48  ;;  %932 = vst [vmem:[%s1574_s12 + $0x190] sm:$0xff] %v868_v53  ;;  %v869_v3 = vadd.f32 %v805_v35, %v674_v54  ;;  %v613_v4 = vmul.f32 %v1163_v50, %v1521_v6  ;;  %v1232_v35 = vld [vmem:[%s1507_s10 + $0x7d0] sm:$0xff]  ;;  %v1168_v42 = vld [vmem:[%s1507_s10 + $0x5d8] sm:$0xff]  ;;  %v227_v48 = vld [vmem:[%s1507_s10 + $0x1e0] sm:$0xff] }
  0xa1   : > { %v808_v7 = vmul.f32 %v1228_v51, %v1527_v11  ;;  %v288_v8 = vmul.f32 %v1514_v1, %v222_v52  ;;  %v482_v13 = vadd.f32 %v418_v62, %v287_v61  ;;  %v419_v14 = vmul.f32 %v1099_v57, %v1519_v5  ;;  %v1104_v49 = vld [vmem:[%s1507_s10 + $0x3e0] sm:$0xff]  ;;  %v1105_v61 = vld [vmem:[%s1507_s10 + $0x3e8] sm:$0xff] }
  0xa2   : > { %v870_v10 = vadd.f32 %v806_v47, %v675_v59  ;;  %v676_v12 = vadd.f32 %v612_v55, %v481_v60  ;;  %933 = vst [vmem:[%s1574_s12 + $0x198] sm:$0xff] %v869_v3  ;;  %v614_v18 = vmul.f32 %v1164_v58, %v1521_v6  ;;  %v809_v19 = vmul.f32 %v1229_v63, %v1527_v11  ;;  %v1233_v47 = vld [vmem:[%s1507_s10 + $0x7d8] sm:$0xff]  ;;  %v1169_v54 = vld [vmem:[%s1507_s10 + $0x5e0] sm:$0xff]  ;;  %v228_v60 = vld [vmem:[%s1507_s10 + $0x1e8] sm:$0xff] }
  0xa3   : > { %v289_v20 = vmul.f32 %v1514_v1, %v223_v0  ;;  %v420_v21 = vmul.f32 %v1100_v2, %v1519_v5  ;;  %v677_v25 = vadd.f32 %v613_v4, %v482_v13  ;;  %v483_v26 = vadd.f32 %v419_v14, %v288_v8  ;;  %v1234_v59 = vld [vmem:[%s1507_s10 + $0x7e0] sm:$0xff]  ;;  %v1170_v3 = vld [vmem:[%s1507_s10 + $0x5e8] sm:$0xff]  ;;  %v1106_v13 = vld [vmem:[%s1507_s10 + $0x3f0] sm:$0xff] }
  0xa4   : > { %934 = vst [vmem:[%s1574_s12 + $0x1a0] sm:$0xff] %v870_v10  ;;  %v871_v24 = vadd.f32 %v807_v56, %v676_v12  ;;  %v615_v27 = vmul.f32 %v1165_v9, %v1521_v6  ;;  %v810_v31 = vmul.f32 %v1230_v15, %v1527_v11  ;;  %v290_v32 = vmul.f32 %v1514_v1, %v224_v16  ;;  %v1235_v4 = vld [vmem:[%s1507_s10 + $0x7e8] sm:$0xff]  ;;  %v229_v12 = vld [vmem:[%s1507_s10 + $0x1f0] sm:$0xff] }
  0xa5   : > { %v484_v30 = vadd.f32 %v420_v21, %v289_v20  ;;  %v421_v33 = vmul.f32 %v1101_v17, %v1519_v5  ;;  %v872_v37 = vadd.f32 %v808_v7, %v677_v25  ;;  %v678_v38 = vadd.f32 %v614_v18, %v483_v26  ;;  %v1171_v18 = vld [vmem:[%s1507_s10 + $0x5f0] sm:$0xff]  ;;  %v230_v20 = vld [vmem:[%s1507_s10 + $0x1f8] sm:$0xff] }
  0xa6   : > { %935 = vst [vmem:[%s1574_s12 + $0x1a8] sm:$0xff] %v871_v24  ;;  %v616_v39 = vmul.f32 %v1166_v22, %v1521_v6  ;;  %v811_v40 = vmul.f32 %v1231_v23, %v1527_v11  ;;  %v291_v45 = vmul.f32 %v1514_v1, %v225_v28  ;;  %v422_v46 = vmul.f32 %v1102_v29, %v1519_v5  ;;  %v1107_v25 = vld [vmem:[%s1507_s10 + $0x3f8] sm:$0xff] }
  0xa7   : > { %v679_v43 = vadd.f32 %v615_v27, %v484_v30  ;;  %v485_v44 = vadd.f32 %v421_v33, %v290_v32  ;;  %936 = vst [vmem:[%s1574_s12 + $0x1b0] sm:$0xff] %v872_v37  ;;  %v873_v50 = vadd.f32 %v809_v19, %v678_v38  ;;  %v617_v51 = vmul.f32 %v1167_v34, %v1521_v6  ;;  %v1236_v19 = vld [vmem:[%s1507_s10 + $0x7f0] sm:$0xff]  ;;  %v1172_v30 = vld [vmem:[%s1507_s10 + $0x5f8] sm:$0xff] }
  0xa8   : > { %v812_v52 = vmul.f32 %v1232_v35, %v1527_v11  ;;  %v292_v53 = vmul.f32 %v1514_v1, %v226_v36  ;;  %v486_v57 = vadd.f32 %v422_v46, %v291_v45  ;;  %v423_v58 = vmul.f32 %v1103_v41, %v1519_v5  ;;  %v1237_v35 = vld [vmem:[%s1507_s10 + $0x7f8] sm:$0xff] }
  0xa9   : > { %v874_v55 = vadd.f32 %v810_v31, %v679_v43  ;;  %v680_v56 = vadd.f32 %v616_v39, %v485_v44  ;;  %937 = vst [vmem:[%s1574_s12 + $0x1b8] sm:$0xff] %v873_v50  ;;  %v618_v62 = vmul.f32 %v1168_v42, %v1521_v6  ;;  %v813_v63 = vmul.f32 %v1233_v47, %v1527_v11 }
  0xaa   : > { %v293_v0 = vmul.f32 %v1514_v1, %v227_v48  ;;  %v424_v2 = vmul.f32 %v1104_v49, %v1519_v5  ;;  %v681_v8 = vadd.f32 %v617_v51, %v486_v57  ;;  %v487_v9 = vadd.f32 %v423_v58, %v292_v53 }
  0xab   : > { %938 = vst [vmem:[%s1574_s12 + $0x1c0] sm:$0xff] %v874_v55  ;;  %v875_v7 = vadd.f32 %v811_v40, %v680_v56  ;;  %v619_v10 = vmul.f32 %v1169_v54, %v1521_v6  ;;  %v814_v15 = vmul.f32 %v1234_v59, %v1527_v11  ;;  %v294_v16 = vmul.f32 %v1514_v1, %v228_v60 }
  0xac   : > { %v488_v14 = vadd.f32 %v424_v2, %v293_v0  ;;  %v425_v17 = vmul.f32 %v1105_v61, %v1519_v5  ;;  %v876_v21 = vadd.f32 %v812_v52, %v681_v8  ;;  %v682_v22 = vadd.f32 %v618_v62, %v487_v9 }
  0xad   : > { %939 = vst [vmem:[%s1574_s12 + $0x1c8] sm:$0xff] %v875_v7  ;;  %v620_v23 = vmul.f32 %v1170_v3, %v1521_v6  ;;  %v815_v24 = vmul.f32 %v1235_v4, %v1527_v11  ;;  %v295_v28 = vmul.f32 %v1514_v1, %v229_v12  ;;  %v426_v29 = vmul.f32 %v1106_v13, %v1519_v5 }
  0xae   : > { %v683_v26 = vadd.f32 %v619_v10, %v488_v14  ;;  %v489_v27 = vadd.f32 %v425_v17, %v294_v16  ;;  %940 = vst [vmem:[%s1574_s12 + $0x1d0] sm:$0xff] %v876_v21  ;;  %v877_v31 = vadd.f32 %v813_v63, %v682_v22  ;;  %v621_v32 = vmul.f32 %v1171_v18, %v1521_v6 }
  0xaf   : > { %v816_v33 = vmul.f32 %v1236_v19, %v1527_v11  ;;  %v296_v34 = vmul.f32 %v1514_v1, %v230_v20  ;;  %v490_v38 = vadd.f32 %v426_v29, %v295_v28  ;;  %v427_v39 = vmul.f32 %v1107_v25, %v1519_v5 }
  0xb0   : > { %v878_v36 = vadd.f32 %v814_v15, %v683_v26  ;;  %v684_v37 = vadd.f32 %v620_v23, %v489_v27  ;;  %941 = vst [vmem:[%s1574_s12 + $0x1d8] sm:$0xff] %v877_v31  ;;  %v622_v40 = vmul.f32 %v1172_v30, %v1521_v6  ;;  %v817_v44 = vmul.f32 %v1237_v35, %v1527_v11 }
  0xb1   : > { %v685_v42 = vadd.f32 %v621_v32, %v490_v38  ;;  %v491_v43 = vadd.f32 %v427_v39, %v296_v34 }
  0xb2   : > { %942 = vst [vmem:[%s1574_s12 + $0x1e0] sm:$0xff] %v878_v36  ;;  %v879_v41 = vadd.f32 %v815_v24, %v684_v37 }
  0xb3   : > { %v880_v1 = vadd.f32 %v816_v33, %v685_v42  ;;  %v686_v45 = vadd.f32 %v622_v40, %v491_v43 }
  0xb4   : > { %943 = vst [vmem:[%s1574_s12 + $0x1e8] sm:$0xff] %v879_v41 }
  0xb5   : > { %944 = vst [vmem:[%s1574_s12 + $0x1f0] sm:$0xff] %v880_v1  ;;  %v881_v5 = vadd.f32 %v817_v44, %v686_v45 }
  0xb7   : > { %945 = vst [vmem:[%s1574_s12 + $0x1f8] sm:$0xff] %v881_v5 }
  0xb8   : > { %1326 = shalt.err (!%p1323_p10)
}
  0xb9   : > { %s1327_s5 = scalar_lea.hbm %s2105_s17, 8192  ;;  %s1331_s10 = scalar_lea.hbm %s2155_s2, 16384 }
  0xba   : > { %p1328_p11 = scmp.ne.s32.totalorder %s2105_s17, %s1327_s5  ;;  %p1332_p3 = scmp.lt.u32.totalorder %s2105_s17, %s2155_s2 }
  0xbb   : > { %p1333_p4 = scmp.lt.u32.totalorder %s1331_s10, %s1327_s5  ;;  %p1335_p6 = scmp.lt.u32.totalorder %s1327_s5, %s2105_s17 }
  0xbc   : > { %p1329_p1 = pnand %p1328_p11, %p1468_p12 }
  0xbd   : > { %p1334_p5 = por %p1333_p4, %p1332_p3 }
  0xbe   : > { %p1330_p2 = pneg %p1329_p1 }
  0xbf   : > { %p1336_p7 = por %p1335_p6, %p1334_p5 }
  0xc1   : > { %p1337_p8 = pnand %p1336_p7, %p1330_p2 }
  0xc3   : > { %1340 = shalt.err (!%p1337_p8)
}
  0xc4   : > { %s1391_s9 = smov 128   ;;  %s1392_s11 = smov 8  }
  0xc5   : > { %1255 = dma.vmem_to_hbm [thread:$0]  (%p1468_p12), %s2107_s14, 8192, %s2105_s17, %s947_s18, %s1391_s9, %s1391_s9, %s1392_s11  }
  0xc6 PF: > { %s975_s29 = sand.u32 1, %s1369_s19   ;;  %p1258_p9 = pnand %p1035_p0, %p1472_p13 }
  0xc7   : > { %s976_s12 = scalar_lea.sflag [#allocation6], %s975_s29 }
  0xc8   : > { %1364 = dma.done.wait (!%p1258_p9), %s976_s12, 8192  }
  0xc9   : > { %1366 = vsyncadd (!%p1258_p9), %s976_s12, 4294959104  ;;  %p19_p10 = scmp.ge.s32.totalorder %s1445_s24, 4   ;;  %s2160_s19 = smov %s1373_s20 }
  0xca   : > { %s2161_s20 = smov %s1377_s21  ;;  %s2162_s21 = smov %s1457_s27 }
  0xcb   : > { %s2163_s22 = smov %s1445_s24  ;;  %21 = sbr.rel (!%p19_p10) target bundleno = 17 (0x11), region = 77 }
  0xd2   :  { %981 = vsyncpa [#allocation5], 1 }
  0xd3   :  { %983 = vsyncpa [#allocation5 + $0x1], 1 }
  0xd4   :  { %984 = vsyncpa [#allocation6], 1 }
  0xd5   :  { %986 = vsyncpa [#allocation6 + $0x1], 1 }

</bundles_post_ra>
